<compile_context>
chip_gen: v7x
topology: tpu7x:2x2x1
jax: 0.10.0
libtpu: 0.0.40
codegen_flags: <defaults>
</compile_context>

<pallas_src>
import functools

import jax
import jax.numpy as jnp
from jax.experimental import pallas as pl
from jax.experimental.pallas import tpu as pltpu


def actor_kernel(x_ref, w1_ref, b1_ref, w2_ref, b2_ref, wh_ref, bh_ref,
                 out_ref, *, act_dim):
    """One batch tile of the Actor forward.

    out_ref columns: [0, act_dim) = mean, [act_dim, 2*act_dim) = std, rest = padding.
    """
    x = x_ref[...]
    wdt = w1_ref.dtype  # bf16 (or f32); cast only the dot operands, accumulate f32.

    # Hidden layer 1: Linear(obs_dim, 256) + ReLU   (MXU, f32 accumulate)
    h1 = jnp.dot(x.astype(wdt), w1_ref[...],
                 preferred_element_type=jnp.float32) + b1_ref[...]
    h1 = jnp.maximum(h1, 0.0)

    # Hidden layer 2: Linear(256, 256) + ReLU
    h2 = jnp.dot(h1.astype(wdt), w2_ref[...],
                 preferred_element_type=jnp.float32) + b2_ref[...]
    h2 = jnp.maximum(h2, 0.0)

    # Fused heads: single matmul into one lane-dense slab.
    heads = jnp.dot(h2.astype(wdt), wh_ref[...],
                    preferred_element_type=jnp.float32) + bh_ref[...]

    lane = jax.lax.broadcasted_iota(jnp.int32, heads.shape, 1)   # 2-D iota (TPU req.)
    std = jnp.exp(jnp.clip(heads, -5.0, 2.0))                    # EUP exp
    out = jnp.where(lane >= act_dim, std, heads)                 # mean lanes untouched
    out_ref[...] = out.astype(out_ref.dtype)


@functools.partial(jax.jit,
                   static_argnames=("tile_b", "weight_dtype", "out_dtype"))
def actor_forward(x, params, *, tile_b=2048, weight_dtype=jnp.bfloat16,
                  out_dtype=jnp.bfloat16):
    """x: (B, obs_dim) f32. params: dict of f32 weights/biases. Returns (mu, std) f32."""
    B, obs_dim = x.shape
    hidden = params["w1"].shape[1]
    act_dim = params["wm"].shape[1]

    # One lane-dense head slab: mean at [0,act_dim), log_std at [act_dim,2*act_dim).
    head_w = 128 * pl.cdiv(2 * act_dim, 128)
    wh = jnp.zeros((hidden, head_w), jnp.float32)
    wh = wh.at[:, :act_dim].set(params["wm"])
    wh = wh.at[:, act_dim:2 * act_dim].set(params["ws"])
    bh = jnp.zeros((1, head_w), jnp.float32)
    bh = bh.at[:, :act_dim].set(params["bm"][0])
    bh = bh.at[:, act_dim:2 * act_dim].set(params["bs"][0])

    # Weights in bf16 (halves HBM traffic, doubles MXU rate); biases stay f32.
    w1 = params["w1"].astype(weight_dtype)
    w2 = params["w2"].astype(weight_dtype)
    wh = wh.astype(weight_dtype)
    b1, b2 = params["b1"], params["b2"]

    # Batch tile: multiple of 8; keep >= 2 grid tiles when B allows (v7x megacore),
    # no padding of x -- Pallas masks the ragged last block.
    if B <= 8:
        tb = B                              # block == full dim, always legal
    else:
        half = 8 * pl.cdiv(B, 16)           # ~B/2 rounded up to a multiple of 8
        tb = max(8, (min(int(tile_b), half) // 8) * 8)
    num_tiles = pl.cdiv(B, tb)

    const = lambda a: pl.BlockSpec(a.shape, lambda i: (0,) * a.ndim)  # resident in VMEM

    out = pl.pallas_call(
        functools.partial(actor_kernel, act_dim=act_dim),
        out_shape=jax.ShapeDtypeStruct((B, head_w), out_dtype),
        grid=(num_tiles,),
        in_specs=[pl.BlockSpec((tb, obs_dim), lambda i: (i, 0)),
                  const(w1), const(b1), const(w2), const(b2),
                  const(wh), const(bh)],
        out_specs=pl.BlockSpec((tb, head_w), lambda i: (i, 0)),
        compiler_params=pltpu.CompilerParams(
            dimension_semantics=("parallel",),          # shards tiles across v7x's 2 TCs
            vmem_limit_bytes=32 * 1024 * 1024,          # ~8-10 MiB working set at tb=2048
        ),
    )(x, w1, b1, w2, b2, wh, bh)

    mu = out[:, :act_dim].astype(jnp.float32)
    std = out[:, act_dim:2 * act_dim].astype(jnp.float32)
    return mu, std


def init_params(key, obs_dim, act_dim, hidden=256):
    """PyTorch-Linear-style init: U(-1/sqrt(fan_in), 1/sqrt(fan_in)).
    Weights stored as (in_features, out_features); biases as (1, out_features)."""
    def linear(k, fan_in, fan_out):
        kw, kb = jax.random.split(k)
        bound = 1.0 / jnp.sqrt(jnp.float32(fan_in))
        w = jax.random.uniform(kw, (fan_in, fan_out), jnp.float32, -bound, bound)
        b = jax.random.uniform(kb, (1, fan_out), jnp.float32, -bound, bound)
        return w, b

    k1, k2, k3, k4 = jax.random.split(key, 4)
    w1, b1 = linear(k1, obs_dim, hidden)
    w2, b2 = linear(k2, hidden, hidden)
    wm, bm = linear(k3, hidden, act_dim)
    ws, bs = linear(k4, hidden, act_dim)
    return {"w1": w1, "b1": b1, "w2": w2, "b2": b2,
            "wm": wm, "bm": bm, "ws": ws, "bs": bs}


def actor_ref(x, p, weight_dtype=jnp.float32):
    """Pure-JAX reference of the PyTorch forward (optionally mirroring bf16 dot operands)."""
    def dot(a, w):
        return jnp.dot(a.astype(weight_dtype), w.astype(weight_dtype),
                       preferred_element_type=jnp.float32)
    h = jnp.maximum(dot(x, p["w1"]) + p["b1"], 0.0)
    h = jnp.maximum(dot(h, p["w2"]) + p["b2"], 0.0)
    mu = dot(h, p["wm"]) + p["bm"]
    log_std = jnp.clip(dot(h, p["ws"]) + p["bs"], -5.0, 2.0)
    return mu, jnp.exp(log_std)


def _check(x, params):
    mu, std = actor_forward(x, params)
    jax.block_until_ready((mu, std))
    B = x.shape[0]
    act_dim = params["wm"].shape[1]
    assert mu.shape == (B, act_dim) and std.shape == (B, act_dim)

    # Tight check against a reference mirroring the kernel's bf16 dot operands
    # (remaining delta is bf16 rounding of the output slab).
    mu_bf, std_bf = actor_ref(x, params, jnp.bfloat16)
    assert jnp.allclose(mu, mu_bf, atol=2e-2, rtol=2e-2)
    assert jnp.allclose(std, std_bf, atol=2e-2, rtol=2e-2)

    # Looser check against the exact f32 PyTorch semantics (bf16 weight/output rounding).
    mu_f32, std_f32 = actor_ref(x, params)
    assert jnp.allclose(mu, mu_f32, atol=5e-2, rtol=5e-2)
    assert jnp.allclose(std, std_f32, atol=5e-2, rtol=5e-2)


if __name__ == "__main__":
    key = jax.random.PRNGKey(0)
    k_x, k_x2, k_p = jax.random.split(key, 3)

    obs_dim, act_dim = 32, 8
    params = init_params(k_p, obs_dim, act_dim)

    # Small, tile-divisible batch.
    _check(jax.random.normal(k_x, (8, obs_dim), jnp.float32), params)
    # Ragged batch (exercises Pallas-masked last tile, no wrapper padding).
    _check(jax.random.normal(k_x2, (13, obs_dim), jnp.float32), params)

    print("KERNEL_OK")
</pallas_src>

<mosaic_0001>
module attributes {stable_mosaic.version = 11 : i64} {
  func.func @actor_kernel(%arg0: i32, %arg1: memref<8x32xf32, #tpu.memory_space<vmem>>, %arg2: memref<32x256xbf16, #tpu.memory_space<vmem>>, %arg3: memref<1x256xf32, #tpu.memory_space<vmem>>, %arg4: memref<256x256xbf16, #tpu.memory_space<vmem>>, %arg5: memref<1x256xf32, #tpu.memory_space<vmem>>, %arg6: memref<256x128xbf16, #tpu.memory_space<vmem>>, %arg7: memref<1x128xf32, #tpu.memory_space<vmem>>, %arg8: memref<8x128xbf16, #tpu.memory_space<vmem>>) attributes {dimension_semantics = [#tpu.dimension_semantics<parallel>], iteration_bounds = array<i64: 1>, scalar_prefetch = 0 : i64, scratch_operands = 0 : i64, tpu.core_type = #tpu.core_type<tc>, window_params = [{transform_indices = @transform_0, window_bounds = array<i64: 8, 32>}, {pipeline_mode = #tpu.pipeline_mode<synchronous>, transform_indices = @transform_1, window_bounds = array<i64: 32, 256>}, {pipeline_mode = #tpu.pipeline_mode<synchronous>, transform_indices = @transform_2, window_bounds = array<i64: 1, 256>}, {pipeline_mode = #tpu.pipeline_mode<synchronous>, transform_indices = @transform_3, window_bounds = array<i64: 256, 256>}, {pipeline_mode = #tpu.pipeline_mode<synchronous>, transform_indices = @transform_4, window_bounds = array<i64: 1, 256>}, {pipeline_mode = #tpu.pipeline_mode<synchronous>, transform_indices = @transform_5, window_bounds = array<i64: 256, 128>}, {pipeline_mode = #tpu.pipeline_mode<synchronous>, transform_indices = @transform_6, window_bounds = array<i64: 1, 128>}, {transform_indices = @transform_7, window_bounds = array<i64: 8, 128>}]} {
    %c0 = arith.constant 0 : index
    %c0_0 = arith.constant 0 : index
    %0 = vector.load %arg1[%c0, %c0_0] : memref<8x32xf32, #tpu.memory_space<vmem>>, vector<8x32xf32>
    %1 = arith.truncf %0 : vector<8x32xf32> to vector<8x32xbf16>
    %c0_1 = arith.constant 0 : index
    %c0_2 = arith.constant 0 : index
    %2 = vector.load %arg2[%c0_1, %c0_2] : memref<32x256xbf16, #tpu.memory_space<vmem>>, vector<32x256xbf16>
    %cst = arith.constant dense<0.000000e+00> : vector<8x256xf32>
    %3 = tpu.matmul %1, %2, %cst {dimension_numbers = #tpu.dot_dimension_numbers<[1], [0], [0], [1], [0, 0, 1, 1], [], []>} : vector<8x32xbf16>, vector<32x256xbf16>, vector<8x256xf32> -> vector<8x256xf32>
    %c0_3 = arith.constant 0 : index
    %c0_4 = arith.constant 0 : index
    %4 = vector.load %arg3[%c0_3, %c0_4] : memref<1x256xf32, #tpu.memory_space<vmem>>, vector<1x256xf32>
    %5 = vector.broadcast %4 : vector<1x256xf32> to vector<8x256xf32>
    %6 = arith.addf %3, %5 : vector<8x256xf32>
    %cst_5 = arith.constant 0.000000e+00 : f32
    %7 = vector.broadcast %cst_5 : f32 to vector<8x256xf32>
    %8 = arith.maximumf %6, %7 : vector<8x256xf32>
    %9 = arith.truncf %8 : vector<8x256xf32> to vector<8x256xbf16>
    %c0_6 = arith.constant 0 : index
    %c0_7 = arith.constant 0 : index
    %10 = vector.load %arg4[%c0_6, %c0_7] : memref<256x256xbf16, #tpu.memory_space<vmem>>, vector<256x256xbf16>
    %cst_8 = arith.constant dense<0.000000e+00> : vector<8x256xf32>
    %11 = tpu.matmul %9, %10, %cst_8 {dimension_numbers = #tpu.dot_dimension_numbers<[1], [0], [0], [1], [0, 0, 1, 1], [], []>} : vector<8x256xbf16>, vector<256x256xbf16>, vector<8x256xf32> -> vector<8x256xf32>
    %c0_9 = arith.constant 0 : index
    %c0_10 = arith.constant 0 : index
    %12 = vector.load %arg5[%c0_9, %c0_10] : memref<1x256xf32, #tpu.memory_space<vmem>>, vector<1x256xf32>
    %13 = vector.broadcast %12 : vector<1x256xf32> to vector<8x256xf32>
    %14 = arith.addf %11, %13 : vector<8x256xf32>
    %cst_11 = arith.constant 0.000000e+00 : f32
    %15 = vector.broadcast %cst_11 : f32 to vector<8x256xf32>
    %16 = arith.maximumf %14, %15 : vector<8x256xf32>
    %17 = arith.truncf %16 : vector<8x256xf32> to vector<8x256xbf16>
    %c0_12 = arith.constant 0 : index
    %c0_13 = arith.constant 0 : index
    %18 = vector.load %arg6[%c0_12, %c0_13] : memref<256x128xbf16, #tpu.memory_space<vmem>>, vector<256x128xbf16>
    %cst_14 = arith.constant dense<0.000000e+00> : vector<8x128xf32>
    %19 = tpu.matmul %17, %18, %cst_14 {dimension_numbers = #tpu.dot_dimension_numbers<[1], [0], [0], [1], [0, 0, 1, 1], [], []>} : vector<8x256xbf16>, vector<256x128xbf16>, vector<8x128xf32> -> vector<8x128xf32>
    %c0_15 = arith.constant 0 : index
    %c0_16 = arith.constant 0 : index
    %20 = vector.load %arg7[%c0_15, %c0_16] : memref<1x128xf32, #tpu.memory_space<vmem>>, vector<1x128xf32>
    %21 = vector.broadcast %20 : vector<1x128xf32> to vector<8x128xf32>
    %22 = arith.addf %19, %21 : vector<8x128xf32>
    %23 = tpu.iota {dimensions = array<i32: 1>} : vector<8x128xi32>
    %cst_17 = arith.constant -5.000000e+00 : f32
    %cst_18 = arith.constant 2.000000e+00 : f32
    %24 = vector.broadcast %cst_17 : f32 to vector<8x128xf32>
    %25 = arith.maximumf %24, %22 : vector<8x128xf32>
    %26 = vector.broadcast %cst_18 : f32 to vector<8x128xf32>
    %27 = arith.minimumf %26, %25 : vector<8x128xf32>
    %28 = math.exp %27 : vector<8x128xf32>
    %c8_i32 = arith.constant 8 : i32
    %29 = vector.broadcast %c8_i32 : i32 to vector<8x128xi32>
    %30 = arith.cmpi sge, %23, %29 : vector<8x128xi32>
    %31 = arith.select %30, %28, %22 : vector<8x128xi1>, vector<8x128xf32>
    %32 = arith.truncf %31 : vector<8x128xf32> to vector<8x128xbf16>
    %c0_19 = arith.constant 0 : index
    %c0_20 = arith.constant 0 : index
    %33 = vector.load %arg8[%c0_19, %c0_20] : memref<8x128xbf16, #tpu.memory_space<vmem>>, vector<8x128xbf16>
    tpu.vector_store %arg8[%c0_19, %c0_20], %32 {strides = array<i32>} : memref<8x128xbf16, #tpu.memory_space<vmem>>, vector<8x128xbf16>,
    return
  }
  func.func @transform_0(%arg0: i32) -> (i32, i32) {
    %c0_i32 = arith.constant 0 : i32
    %c0_i32_0 = arith.constant 0 : i32
    return %arg0, %c0_i32 : i32, i32
  }
  func.func @transform_1(%arg0: i32) -> (i32, i32) {
    %c0_i32 = arith.constant 0 : i32
    %c0_i32_0 = arith.constant 0 : i32
    %c0_i32_1 = arith.constant 0 : i32
    return %c0_i32, %c0_i32_0 : i32, i32
  }
  func.func @transform_2(%arg0: i32) -> (i32, i32) {
    %c0_i32 = arith.constant 0 : i32
    %c0_i32_0 = arith.constant 0 : i32
    %c0_i32_1 = arith.constant 0 : i32
    return %c0_i32, %c0_i32_0 : i32, i32
  }
  func.func @transform_3(%arg0: i32) -> (i32, i32) {
    %c0_i32 = arith.constant 0 : i32
    %c0_i32_0 = arith.constant 0 : i32
    %c0_i32_1 = arith.constant 0 : i32
    return %c0_i32, %c0_i32_0 : i32, i32
  }
  func.func @transform_4(%arg0: i32) -> (i32, i32) {
    %c0_i32 = arith.constant 0 : i32
    %c0_i32_0 = arith.constant 0 : i32
    %c0_i32_1 = arith.constant 0 : i32
    return %c0_i32, %c0_i32_0 : i32, i32
  }
  func.func @transform_5(%arg0: i32) -> (i32, i32) {
    %c0_i32 = arith.constant 0 : i32
    %c0_i32_0 = arith.constant 0 : i32
    %c0_i32_1 = arith.constant 0 : i32
    return %c0_i32, %c0_i32_0 : i32, i32
  }
  func.func @transform_6(%arg0: i32) -> (i32, i32) {
    %c0_i32 = arith.constant 0 : i32
    %c0_i32_0 = arith.constant 0 : i32
    %c0_i32_1 = arith.constant 0 : i32
    return %c0_i32, %c0_i32_0 : i32, i32
  }
  func.func @transform_7(%arg0: i32) -> (i32, i32) {
    %c0_i32 = arith.constant 0 : i32
    %c0_i32_0 = arith.constant 0 : i32
    return %arg0, %c0_i32 : i32, i32
  }
}

</mosaic_0001>

<bundles_post_ra>
// kernel: actor_forward.1
= control target key start
LH: loop header
LB: loop body
LE: loop exit
PB: predicated region body
PF: predicated region fallthrough
CT: control target
= control target key end

     0   :  { %v701_v1 = vmov 0   ;;  %vm65_vm0 = vcmask 261120   ;;  %v35_v51 = vlaneseq  ;;  %s913_s1 = inlined_call_operand.vmem [shape: bf16[32,256], index: 1, kind: input, shape index: {}]   ;;  %s914_s0 = inlined_call_operand.vmem [shape: f32[8,32], index: 0, kind: input, shape index: {}]   ;;  %s915_s3 = inlined_call_operand.vmem [shape: bf16[256,256], index: 3, kind: input, shape index: {}]   ;;  %s916_s5 = inlined_call_operand.vmem [shape: bf16[256,128], index: 5, kind: input, shape index: {}]   ;;  %s917_s2 = inlined_call_operand.vmem [shape: f32[1,256], index: 2, kind: input, shape index: {}]   ;;  %s918_s4 = inlined_call_operand.vmem [shape: f32[1,256], index: 4, kind: input, shape index: {}]   ;;  %s919_s6 = inlined_call_operand.vmem [shape: f32[1,128], index: 6, kind: input, shape index: {}]   ;;  %s920_s7 = inlined_call_operand.vmem [shape: bf16[8,128], index: 7, kind: output, shape index: {}]  }
   0x1   :  { %v629_v0 = vld [vmem:[%s913_s1 + $0x4] ss:$8 sps:$4 sm:$0xff]   ;;  %101 = vmatprep.mubr.bf16.mxu0 %v701_v1  ;;  %v631_v2 = vld [vmem:[%s913_s1] ss:$8 sps:$4 sm:$0xff]   ;;  %v632_v3 = vld [vmem:[%s913_s1 + $0x14] ss:$8 sps:$4 sm:$0xff]  }
   0x2   :  { %69 = vmatprep.subr.bf16.mxu0 %v629_v0  ;;  %v634_v4 = vld [vmem:[%s913_s1 + $0x10] ss:$8 sps:$4 sm:$0xff]   ;;  %v27_v5 = vld [vmem:[%s914_s0] sm:$0xff]  ;;  %v638_v8 = vld [vmem:[%s915_s3 + $0x14] ss:$8 sps:$4 sm:$0xff]   ;;  %v36_v52 = vshrl.u32 %v35_v51, 7 }
   0x3   :  { %70 = vmatpush1.bf16.msra.mxu0 %v631_v2  ;;  %v635_v6 = vld [vmem:[%s915_s3 + $0x4] ss:$8 sps:$4 sm:$0xff]   ;;  %v637_v7 = vld [vmem:[%s915_s3] ss:$8 sps:$4 sm:$0xff]   ;;  %v28_v9 = vpack.c.bf16 %v27_v5, %v27_v5  ;;  %v640_v10 = vld [vmem:[%s915_s3 + $0x10] ss:$8 sps:$4 sm:$0xff]  }
   0x4   :  { %71 = vmatprep.subr.bf16.mxu0 %v632_v3  ;;  %318 = vmatprep.subr.bf16.mxu1 %v635_v6  ;;  %v641_v11 = vld [vmem:[%s915_s3 + $0x24] ss:$8 sps:$4 sm:$0xff]   ;;  %v643_v12 = vld [vmem:[%s915_s3 + $0x20] ss:$8 sps:$4 sm:$0xff]   ;;  %v644_v13 = vld [vmem:[%s915_s3 + $0x34] ss:$8 sps:$4 sm:$0xff]  }
   0x5   :  { %319 = vmatpush1.bf16.msra.mxu1 %v637_v7  ;;  %v646_v14 = vld [vmem:[%s915_s3 + $0x30] ss:$8 sps:$4 sm:$0xff]   ;;  %v647_v15 = vld [vmem:[%s915_s3 + $0x44] ss:$8 sps:$4 sm:$0xff]   ;;  %v649_v16 = vld [vmem:[%s915_s3 + $0x40] ss:$8 sps:$4 sm:$0xff]  }
   0x6   :  { %320 = vmatprep.subr.bf16.mxu1 %v638_v8  ;;  %v650_v17 = vld [vmem:[%s915_s3 + $0x54] ss:$8 sps:$4 sm:$0xff]   ;;  %v652_v18 = vld [vmem:[%s915_s3 + $0x50] ss:$8 sps:$4 sm:$0xff]   ;;  %v653_v19 = vld [vmem:[%s915_s3 + $0x64] ss:$8 sps:$4 sm:$0xff]  }
   0x7   :  { %72 = vmatpush1.bf16.msra.mxu0 %v634_v4  ;;  %v655_v20 = vld [vmem:[%s915_s3 + $0x60] ss:$8 sps:$4 sm:$0xff]   ;;  %v656_v21 = vld [vmem:[%s915_s3 + $0x74] ss:$8 sps:$4 sm:$0xff]   ;;  %v658_v22 = vld [vmem:[%s915_s3 + $0x70] ss:$8 sps:$4 sm:$0xff]  }
   0x8   :  { %v659_v23 = vld [vmem:[%s915_s3 + $0x84] ss:$8 sps:$4 sm:$0xff]   ;;  %v661_v24 = vld [vmem:[%s915_s3 + $0x80] ss:$8 sps:$4 sm:$0xff]   ;;  %v662_v25 = vld [vmem:[%s915_s3 + $0x94] ss:$8 sps:$4 sm:$0xff]  }
   0x9   :  { %321 = vmatpush1.bf16.msra.mxu1 %v640_v10  ;;  %v664_v26 = vld [vmem:[%s915_s3 + $0x90] ss:$8 sps:$4 sm:$0xff]   ;;  %v665_v27 = vld [vmem:[%s915_s3 + $0xa4] ss:$8 sps:$4 sm:$0xff]   ;;  %v667_v28 = vld [vmem:[%s915_s3 + $0xa0] ss:$8 sps:$4 sm:$0xff]  }
   0xa   :  { %556 = vmatmul.mubr.msk.bf16.vlgmr.msra.gmra.mrb[0].mxu0 %vm65_vm0, %v28_v9  ;;  %322 = vmatprep.subr.bf16.mxu1 %v641_v11  ;;  %v668_v29 = vld [vmem:[%s915_s3 + $0xb4] ss:$8 sps:$4 sm:$0xff]   ;;  %v670_v30 = vld [vmem:[%s915_s3 + $0xb0] ss:$8 sps:$4 sm:$0xff]   ;;  %v671_v31 = vld [vmem:[%s915_s3 + $0xc4] ss:$8 sps:$4 sm:$0xff]  }
   0xb   :  { %v673_v32 = vld [vmem:[%s915_s3 + $0xc0] ss:$8 sps:$4 sm:$0xff]   ;;  %v674_v33 = vld [vmem:[%s915_s3 + $0xd4] ss:$8 sps:$4 sm:$0xff]   ;;  %v676_v34 = vld [vmem:[%s915_s3 + $0xd0] ss:$8 sps:$4 sm:$0xff]  }
   0xc   :  { %v677_v35 = vld [vmem:[%s915_s3 + $0xe4] ss:$8 sps:$4 sm:$0xff]   ;;  %v679_v36 = vld [vmem:[%s915_s3 + $0xe0] ss:$8 sps:$4 sm:$0xff]   ;;  %v680_v37 = vld [vmem:[%s915_s3 + $0xf4] ss:$8 sps:$4 sm:$0xff]  }
   0xd   :  { %323 = vmatpush1.bf16.msra.mxu1 %v643_v12  ;;  %v682_v38 = vld [vmem:[%s915_s3 + $0xf0] ss:$8 sps:$4 sm:$0xff]   ;;  %v683_v39 = vld [vmem:[%s916_s5 + $0x40] sm:$0xff]   ;;  %v685_v41 = vld [vmem:[%s916_s5 + $0x48] sm:$0xff]   ;;  %v37_v53 = vsub.s32 0, %v36_v52  ;;  %v41_v55 = vsub.s32 1, %v36_v52 }
   0xe   :  { %324 = vmatprep.subr.bf16.mxu1 %v644_v13  ;;  %v684_v40 = vld [vmem:[%s916_s5] sm:$0xff]   ;;  %606 = vmatprep.subr.bf16.mxu0 %v683_v39  ;;  %v686_v42 = vld [vmem:[%s916_s5 + $0x8] sm:$0xff]   ;;  %v687_v43 = vld [vmem:[%s916_s5 + $0x50] sm:$0xff]  }
   0xf   :  { %607 = vmatpush3.bf16.msra.mxu0 %v684_v40  ;;  %v688_v44 = vld [vmem:[%s916_s5 + $0x10] sm:$0xff]   ;;  %v689_v45 = vld [vmem:[%s916_s5 + $0x58] sm:$0xff]   ;;  %v691_v47 = vld [vmem:[%s916_s5 + $0x60] sm:$0xff]  }
  0x10   :  { %608 = vmatprep.subr.bf16.mxu0 %v685_v41  ;;  %v690_v46 = vld [vmem:[%s916_s5 + $0x18] sm:$0xff]   ;;  %v692_v48 = vld [vmem:[%s916_s5 + $0x20] sm:$0xff]   ;;  %v693_v49 = vld [vmem:[%s916_s5 + $0x68] sm:$0xff]  }
  0x11   :  { %325 = vmatpush1.bf16.msra.mxu1 %v646_v14  ;;  %v694_v50 = vld [vmem:[%s916_s5 + $0x28] sm:$0xff]   ;;  %v33_v54 = vld [vmem:[%s917_s2] sm:$0x3]  ;;  %v695_v4 = vld [vmem:[%s916_s5 + $0x70] sm:$0xff]  }
  0x12   :  { %326 = vmatprep.subr.bf16.mxu1 %v647_v15  ;;  %v38_v56 = vrot.slane %v33_v54, %v37_v53  ;;  %v42_v57 = vrot.slane %v33_v54, %v41_v55  ;;  %v696_v5 = vld [vmem:[%s916_s5 + $0x30] sm:$0xff]   ;;  %v697_v6 = vld [vmem:[%s916_s5 + $0x78] sm:$0xff]   ;;  %v146_v8 = vld [vmem:[%s918_s4] sm:$0x3] }
  0x13   :  { %609 = vmatpush3.bf16.msra.mxu0 %v686_v42  ;;  %v698_v7 = vld [vmem:[%s916_s5 + $0x38] sm:$0xff]   ;;  %v151_v9 = vrot.slane %v146_v8, %v37_v53  ;;  %v155_v10 = vrot.slane %v146_v8, %v41_v55 }
  0x14   :  { %610 = vmatprep.subr.bf16.mxu0 %v687_v43 }
  0x15   :  { %327 = vmatpush1.bf16.msra.mxu1 %v649_v16 }
  0x16   :  { %328 = vmatprep.subr.bf16.mxu1 %v650_v17 }
  0x17   :  { %611 = vmatpush3.bf16.msra.mxu0 %v688_v44 }
  0x18   :  { %612 = vmatprep.subr.bf16.mxu0 %v689_v45 }
  0x19   :  { %329 = vmatpush1.bf16.msra.mxu1 %v652_v18 }
  0x1a   :  { %330 = vmatprep.subr.bf16.mxu1 %v653_v19 }
  0x1b   :  { %613 = vmatpush3.bf16.msra.mxu0 %v690_v46 }
  0x1c   :  { %614 = vmatprep.subr.bf16.mxu0 %v691_v47 }
  0x1d   :  { %331 = vmatpush1.bf16.msra.mxu1 %v655_v20 }
  0x1e   :  { %332 = vmatprep.subr.bf16.mxu1 %v656_v21 }
  0x1f   :  { %615 = vmatpush3.bf16.msra.mxu0 %v692_v48 }
  0x20   :  { %616 = vmatprep.subr.bf16.mxu0 %v693_v49 }
  0x21   :  { %333 = vmatpush1.bf16.msra.mxu1 %v658_v22  ;;  %v589_v22 = vld [vmem:[%s919_s6] ss:$0 sm:$0xff] }
  0x22   :  { %334 = vmatprep.subr.bf16.mxu1 %v659_v23 }
  0x23   :  { %617 = vmatpush3.bf16.msra.mxu0 %v694_v50 }
  0x24   :  { %618 = vmatprep.subr.bf16.mxu0 %v695_v4 }
  0x25   :  { %335 = vmatpush1.bf16.msra.mxu1 %v661_v24 }
  0x26   :  { %336 = vmatprep.subr.bf16.mxu1 %v662_v25 }
  0x27   :  { %619 = vmatpush3.bf16.msra.mxu0 %v696_v5 }
  0x28   :  { %620 = vmatprep.subr.bf16.mxu0 %v697_v6 }
  0x29   :  { %337 = vmatpush1.bf16.msra.mxu1 %v664_v26 }
  0x2a   :  { %338 = vmatprep.subr.bf16.mxu1 %v665_v27 }
  0x2b   :  { %621 = vmatpush3.bf16.msra.mxu0 %v698_v7 }
  0x2d   :  { %339 = vmatpush1.bf16.msra.mxu1 %v667_v28 }
  0x2e   :  { %340 = vmatprep.subr.bf16.mxu1 %v668_v29 }
  0x31   :  { %341 = vmatpush1.bf16.msra.mxu1 %v670_v30 }
  0x32   :  { %342 = vmatprep.subr.bf16.mxu1 %v671_v31  ;;  %v539_v31 = vand.u32 127, %v35_v51 }
  0x34   :  { %vm544_vm1 = vcmp.ge.s32.totalorder %v539_v31, 8 }
  0x35   :  { %343 = vmatpush1.bf16.msra.mxu1 %v673_v32 }
  0x36   :  { %344 = vmatprep.subr.bf16.mxu1 %v674_v33 }
  0x39   :  { %345 = vmatpush1.bf16.msra.mxu1 %v676_v34 }
  0x3a   :  { %346 = vmatprep.subr.bf16.mxu1 %v677_v35 }
  0x3d   :  { %347 = vmatpush1.bf16.msra.mxu1 %v679_v36 }
  0x3e   :  { %348 = vmatprep.subr.bf16.mxu1 %v680_v37 }
  0x41   :  { %349 = vmatpush1.bf16.msra.mxu1 %v682_v38 }
  0xdd   :  { %v103_v58 = vpop.f32.mrb[0].mxu0 }
  0xde   :  { %v104_v59 = vadd.f32 %v103_v58, %v38_v56  ;;  %v105_v60 = vpop.f32.mrb[1].mxu0 }
  0xdf   :  { %v106_v61 = vadd.f32 %v105_v60, %v42_v57  ;;  %v107_v62 = vpop.f32.mrb[2].mxu0 }
  0xe0   :  { %v110_v63 = vmax.f32 %v104_v59, 0.0  ;;  %v108_v0 = vpop.f32.mrb[3].mxu0 }
  0xe1   :  { %v111_v1 = vmax.f32 %v106_v61, 0.0 }
  0xe2   :  { %v112_v3 = vpack.c.bf16 %v110_v63, %v110_v63 }
  0xe3   :  { %v113_v2 = vpack.c.bf16 %v111_v1, %v111_v1 }
  0xe5   :  { %350 = vmatprep.mubr.bf16.mxu1 %v113_v2 }
  0xe6   :  { %351 = vmatmul.mubr.bf16.vlgmr.msra.gmra.mrb[0].mxu1 %v112_v3 }
 0x1b9   :  { %v352_v11 = vpop.f32.mrb[0].mxu1 }
 0x1ba   :  { %v353_v12 = vadd.f32 %v352_v11, %v151_v9  ;;  %v354_v13 = vpop.f32.mrb[1].mxu1 }
 0x1bb   :  { %v355_v14 = vadd.f32 %v354_v13, %v155_v10  ;;  %v356_v15 = vpop.f32.mrb[2].mxu1 }
 0x1bc   :  { %v359_v16 = vmax.f32 %v353_v12, 0.0  ;;  %v357_v17 = vpop.f32.mrb[3].mxu1 }
 0x1bd   :  { %v360_v18 = vmax.f32 %v355_v14, 0.0 }
 0x1be   :  { %v361_v20 = vpack.c.bf16 %v359_v16, %v359_v16 }
 0x1bf   :  { %v362_v19 = vpack.c.bf16 %v360_v18, %v360_v18 }
 0x1c1   :  { %530 = vmatprep.mubr.bf16.mxu0 %v362_v19 }
 0x1c2   :  { %531 = vmatmul.mubr.bf16.vlgmr.msra.gmra.mrb[4].mxu0 %v361_v20 }
 0x295   :  { %v622_v21 = vpop.f32.mrb[4].mxu0 }
 0x296   :  { %v623_v23 = vpop.f32.mrb[5].mxu0 }
 0x297   :  { %v624_v24 = vadd.f32 %v623_v23, %v622_v21  ;;  %v625_v25 = vpop.f32.mrb[6].mxu0 }
 0x298   :  { %v626_v26 = vpop.f32.mrb[7].mxu0 }
 0x299   :  { %v533_v27 = vadd.f32 %v624_v24, %v589_v22 }
 0x29b   :  { %v540_v28 = vmax.f32 %v533_v27, -5.0 }
 0x29d   :  { %v541_v29 = vmin.f32 %v540_v28, 2.0 }
 0x29f   :  { %v542_v30 = vmul.f32 1.442695, %v541_v29 }
 0x2a1   :  { %699 = vpow2.f32 %v542_v30 }
 0x2ab   :  { %v700_v32 = vpop.eup %699 }
 0x2ac   :  { %v545_v33 = vsel %vm544_vm1, %v700_v32, %v533_v27 }
 0x2ad   :  { %v546_v34 = vpack.c.bf16 %v545_v33, %v545_v33 }
 0x2af   :  { %547 = vst [vmem:[%s920_s7] sm:$0xf] %v546_v34 }

</bundles_post_ra>
